<compile_context>
chip_gen: v7x
topology: tpu7x:2x2x1
jax: 0.10.0
libtpu: 0.0.40
codegen_flags: <defaults>
</compile_context>

<pallas_src>
import jax
import jax.numpy as jnp
from jax.experimental import pallas as pl
from jax.experimental.pallas import tpu as pltpu

# SELU constants (match torch.nn.SELU defaults)
_SELU_ALPHA = 1.6732632423543772
_SELU_SCALE = 1.0507009873554805

_IN = 30           # input features
_HID = 75          # logical hidden features
_HID_PAD = 128     # hidden features padded to the 128-lane boundary
_OUT = 2           # output features
_MAX_TILE_B = 2048 # batch rows per grid step (safe for v5e's 16 MiB scoped VMEM)
_SMALL_B = 256     # below this, a single full-extent block is used


def _selu_dtype_for_device():
    """bf16 SELU on v6e/v7x (bf16 VPU/EUP); f32 on v5e (no bf16 elementwise units)."""
    try:
        kind = jax.devices()[0].device_kind.lower()
    except Exception:
        return jnp.bfloat16
    if ("v5" in kind and "lite" in kind) or "v5e" in kind:
        return jnp.float32
    return jnp.bfloat16


_SELU_DTYPE = _selu_dtype_for_device()


def _selu(x):
    # Python scalars are weak-typed -> result keeps x's dtype (bf16 or f32).
    return _SELU_SCALE * jnp.where(x > 0, x, _SELU_ALPHA * (jnp.exp(x) - 1.0))


def _generator_kernel(x_ref, w1_ref, b1_ref, w2_ref, b2_ref, w3_ref, b3_ref, o_ref):
    # In-kernel downcast of the streamed x tile (cheap VPU op on (tile_b, 30)).
    x = x_ref[...].astype(jnp.bfloat16)

    # Layer 1: Linear(30 -> 128pad) + SELU   (bf16 MXU operands, f32 accumulation)
    h = jnp.dot(x, w1_ref[...], preferred_element_type=jnp.float32)
    h = _selu(h.astype(_SELU_DTYPE) + b1_ref[...])

    # Layer 2: Linear(128pad -> 128pad) + SELU
    h = jnp.dot(h.astype(jnp.bfloat16), w2_ref[...], preferred_element_type=jnp.float32)
    h = _selu(h.astype(_SELU_DTYPE) + b2_ref[...])

    # Layer 3: Linear(128pad -> 2) + SELU, final math in f32.
    # TODO(synk): if a bundle dump shows the MXU push slot saturating, replace this
    # (K=128, N=2) matmul with a VPU broadcast-multiply + XLU cross-lane reduce.
    h = jnp.dot(h.astype(jnp.bfloat16), w3_ref[...], preferred_element_type=jnp.float32)
    o_ref[...] = _selu(h + b3_ref[...]).astype(o_ref.dtype)


def _pad_params(params):
    """PyTorch-layout params ((out,in) W, (out,) b, f32) -> transposed/padded kernel params."""
    w1, b1, w2, b2, w3, b3 = params
    ph = _HID_PAD - _HID
    w1p = jnp.pad(w1.T, ((0, 0), (0, ph))).astype(jnp.bfloat16)            # (30, 128)
    b1p = jnp.pad(b1, (0, ph)).reshape(1, _HID_PAD).astype(_SELU_DTYPE)    # (1, 128)
    w2p = jnp.pad(w2.T, ((0, ph), (0, ph))).astype(jnp.bfloat16)           # (128, 128)
    b2p = jnp.pad(b2, (0, ph)).reshape(1, _HID_PAD).astype(_SELU_DTYPE)    # (1, 128)
    w3p = jnp.pad(w3.T, ((0, ph), (0, 0))).astype(jnp.bfloat16)            # (128, 2)
    b3p = b3.reshape(1, _OUT).astype(jnp.float32)                          # (1, 2)
    return w1p, b1p, w2p, b2p, w3p, b3p


def _round_up(x, m):
    return ((x + m - 1) // m) * m


def _choose_tile_b(B):
    """Balanced tile size: >=2 even grid steps for B > _SMALL_B (keeps both v7x TCs busy)."""
    if B <= _SMALL_B:
        return B  # single full-extent block is always a legal BlockSpec
    n_steps = max(2, (B + _MAX_TILE_B - 1) // _MAX_TILE_B)
    if n_steps % 2:
        n_steps += 1
    return _round_up((B + n_steps - 1) // n_steps, 16)


@jax.jit
def generator_forward(x, params):
    """x: (B, 30) float32; params in PyTorch nn.Linear layout. Returns (B, 2) float32."""
    B = x.shape[0]
    w1p, b1p, w2p, b2p, w3p, b3p = _pad_params(params)

    tile_b = _choose_tile_b(B)
    grid = (pl.cdiv(B, tile_b),)

    resident = lambda shape: pl.BlockSpec(shape, lambda i: (0, 0))  # weights stay in VMEM

    return pl.pallas_call(
        _generator_kernel,
        out_shape=jax.ShapeDtypeStruct((B, _OUT), jnp.float32),
        grid=grid,
        in_specs=[
            pl.BlockSpec((tile_b, _IN), lambda i: (i, 0)),   # x tiles stream through (f32)
            resident(w1p.shape), resident(b1p.shape),
            resident(w2p.shape), resident(b2p.shape),
            resident(w3p.shape), resident(b3p.shape),
        ],
        out_specs=pl.BlockSpec((tile_b, _OUT), lambda i: (i, 0)),
        compiler_params=pltpu.CompilerParams(
            dimension_semantics=("parallel",),  # v7x shards grid steps across its 2 TCs
        ),
    )(x, w1p, b1p, w2p, b2p, w3p, b3p)


def init_params(key):
    """Deterministic init mimicking PyTorch Linear's U(-1/sqrt(fan_in), 1/sqrt(fan_in)).

    Returned in PyTorch layout: W_i (out_features, in_features), b_i (out_features,).
    """
    dims = [(_IN, _HID), (_HID, _HID), (_HID, _OUT)]
    params = []
    for fan_in, fan_out in dims:
        key, kw, kb = jax.random.split(key, 3)
        bound = float(fan_in) ** -0.5
        w = jax.random.uniform(kw, (fan_out, fan_in), jnp.float32, -bound, bound)
        b = jax.random.uniform(kb, (fan_out,), jnp.float32, -bound, bound)
        params.extend([w, b])
    return tuple(params)


def _reference_f32(x, params):
    """Exact f32 semantics of the PyTorch module."""
    h = x
    for w, b in zip(params[0::2], params[1::2]):
        h = _selu(h @ w.T + b)
    return h


def _reference_kernel_numerics(x, params):
    """Mirror of the kernel numerics: bf16 matmul operands + f32 accumulation,
    bias/SELU in _SELU_DTYPE for layers 1-2, f32 for the output layer."""
    w1, b1, w2, b2, w3, b3 = params
    h = jnp.dot(x.astype(jnp.bfloat16), w1.T.astype(jnp.bfloat16),
                preferred_element_type=jnp.float32)
    h = _selu(h.astype(_SELU_DTYPE) + b1.astype(_SELU_DTYPE))
    h = jnp.dot(h.astype(jnp.bfloat16), w2.T.astype(jnp.bfloat16),
                preferred_element_type=jnp.float32)
    h = _selu(h.astype(_SELU_DTYPE) + b2.astype(_SELU_DTYPE))
    h = jnp.dot(h.astype(jnp.bfloat16), w3.T.astype(jnp.bfloat16),
                preferred_element_type=jnp.float32)
    return _selu(h + b3.astype(jnp.float32))


if __name__ == "__main__":
    key = jax.random.PRNGKey(0)
    key, kx_small, kx_big = jax.random.split(key, 3)
    params = init_params(key)

    # B=8: single-block path.  B=600: multi-step grid + masked partial last tile.
    for B, kx in ((8, kx_small), (600, kx_big)):
        x = jax.random.normal(kx, (B, _IN), dtype=jnp.float32)
        out = jax.block_until_ready(generator_forward(x, params))
        assert out.shape == (B, _OUT), out.shape

        ref_kernel = _reference_kernel_numerics(x, params)  # same numerics as the kernel
        ref_f32 = _reference_f32(x, params)                 # original module (f32) semantics
        assert jnp.allclose(out, ref_kernel, atol=1e-2, rtol=1e-2), \
            f"mismatch vs kernel-numerics reference (B={B})"
        assert jnp.allclose(out, ref_f32, atol=6e-2, rtol=6e-2), \
            f"mismatch vs f32 module reference (B={B})"

    print("KERNEL_OK")
</pallas_src>

<mosaic_0001>
module attributes {stable_mosaic.version = 11 : i64} {
  func.func @_generator_kernel(%arg0: i32, %arg1: memref<8x30xf32, #tpu.memory_space<vmem>>, %arg2: memref<30x128xbf16, #tpu.memory_space<vmem>>, %arg3: memref<1x128xbf16, #tpu.memory_space<vmem>>, %arg4: memref<128x128xbf16, #tpu.memory_space<vmem>>, %arg5: memref<1x128xbf16, #tpu.memory_space<vmem>>, %arg6: memref<128x2xbf16, #tpu.memory_space<vmem>>, %arg7: memref<1x2xf32, #tpu.memory_space<vmem>>, %arg8: memref<8x2xf32, #tpu.memory_space<vmem>>) attributes {dimension_semantics = [#tpu.dimension_semantics<parallel>], iteration_bounds = array<i64: 1>, scalar_prefetch = 0 : i64, scratch_operands = 0 : i64, tpu.core_type = #tpu.core_type<tc>, window_params = [{transform_indices = @transform_0, window_bounds = array<i64: 8, 30>}, {pipeline_mode = #tpu.pipeline_mode<synchronous>, transform_indices = @transform_1, window_bounds = array<i64: 30, 128>}, {pipeline_mode = #tpu.pipeline_mode<synchronous>, transform_indices = @transform_2, window_bounds = array<i64: 1, 128>}, {pipeline_mode = #tpu.pipeline_mode<synchronous>, transform_indices = @transform_3, window_bounds = array<i64: 128, 128>}, {pipeline_mode = #tpu.pipeline_mode<synchronous>, transform_indices = @transform_4, window_bounds = array<i64: 1, 128>}, {pipeline_mode = #tpu.pipeline_mode<synchronous>, transform_indices = @transform_5, window_bounds = array<i64: 128, 2>}, {pipeline_mode = #tpu.pipeline_mode<synchronous>, transform_indices = @transform_6, window_bounds = array<i64: 1, 2>}, {transform_indices = @transform_7, window_bounds = array<i64: 8, 2>}]} {
    %c0 = arith.constant 0 : index
    %c0_0 = arith.constant 0 : index
    %0 = vector.load %arg1[%c0, %c0_0] : memref<8x30xf32, #tpu.memory_space<vmem>>, vector<8x30xf32>
    %1 = arith.truncf %0 : vector<8x30xf32> to vector<8x30xbf16>
    %c0_1 = arith.constant 0 : index
    %c0_2 = arith.constant 0 : index
    %2 = vector.load %arg2[%c0_1, %c0_2] : memref<30x128xbf16, #tpu.memory_space<vmem>>, vector<30x128xbf16>
    %cst = arith.constant dense<0.000000e+00> : vector<8x128xf32>
    %3 = tpu.matmul %1, %2, %cst {dimension_numbers = #tpu.dot_dimension_numbers<[1], [0], [0], [1], [0, 0, 1, 1], [], []>} : vector<8x30xbf16>, vector<30x128xbf16>, vector<8x128xf32> -> vector<8x128xf32>
    %4 = arith.truncf %3 : vector<8x128xf32> to vector<8x128xbf16>
    %c0_3 = arith.constant 0 : index
    %c0_4 = arith.constant 0 : index
    %5 = vector.load %arg3[%c0_3, %c0_4] : memref<1x128xbf16, #tpu.memory_space<vmem>>, vector<1x128xbf16>
    %6 = vector.broadcast %5 : vector<1x128xbf16> to vector<8x128xbf16>
    %7 = arith.addf %4, %6 : vector<8x128xbf16>
    %cst_5 = arith.constant 0.000000e+00 : bf16
    %8 = vector.broadcast %cst_5 : bf16 to vector<8x128xbf16>
    %9 = arith.cmpf ogt, %7, %8 : vector<8x128xbf16>
    %10 = math.exp %7 : vector<8x128xbf16>
    %cst_6 = arith.constant 1.000000e+00 : bf16
    %11 = vector.broadcast %cst_6 : bf16 to vector<8x128xbf16>
    %12 = arith.subf %10, %11 : vector<8x128xbf16>
    %cst_7 = arith.constant 1.671880e+00 : bf16
    %13 = vector.broadcast %cst_7 : bf16 to vector<8x128xbf16>
    %14 = arith.mulf %13, %12 : vector<8x128xbf16>
    %15 = arith.select %9, %7, %14 : vector<8x128xi1>, vector<8x128xbf16>
    %cst_8 = arith.constant 1.046880e+00 : bf16
    %16 = vector.broadcast %cst_8 : bf16 to vector<8x128xbf16>
    %17 = arith.mulf %16, %15 : vector<8x128xbf16>
    %c0_9 = arith.constant 0 : index
    %c0_10 = arith.constant 0 : index
    %18 = vector.load %arg4[%c0_9, %c0_10] : memref<128x128xbf16, #tpu.memory_space<vmem>>, vector<128x128xbf16>
    %cst_11 = arith.constant dense<0.000000e+00> : vector<8x128xf32>
    %19 = tpu.matmul %17, %18, %cst_11 {dimension_numbers = #tpu.dot_dimension_numbers<[1], [0], [0], [1], [0, 0, 1, 1], [], []>} : vector<8x128xbf16>, vector<128x128xbf16>, vector<8x128xf32> -> vector<8x128xf32>
    %20 = arith.truncf %19 : vector<8x128xf32> to vector<8x128xbf16>
    %c0_12 = arith.constant 0 : index
    %c0_13 = arith.constant 0 : index
    %21 = vector.load %arg5[%c0_12, %c0_13] : memref<1x128xbf16, #tpu.memory_space<vmem>>, vector<1x128xbf16>
    %22 = vector.broadcast %21 : vector<1x128xbf16> to vector<8x128xbf16>
    %23 = arith.addf %20, %22 : vector<8x128xbf16>
    %cst_14 = arith.constant 0.000000e+00 : bf16
    %24 = vector.broadcast %cst_14 : bf16 to vector<8x128xbf16>
    %25 = arith.cmpf ogt, %23, %24 : vector<8x128xbf16>
    %26 = math.exp %23 : vector<8x128xbf16>
    %cst_15 = arith.constant 1.000000e+00 : bf16
    %27 = vector.broadcast %cst_15 : bf16 to vector<8x128xbf16>
    %28 = arith.subf %26, %27 : vector<8x128xbf16>
    %cst_16 = arith.constant 1.671880e+00 : bf16
    %29 = vector.broadcast %cst_16 : bf16 to vector<8x128xbf16>
    %30 = arith.mulf %29, %28 : vector<8x128xbf16>
    %31 = arith.select %25, %23, %30 : vector<8x128xi1>, vector<8x128xbf16>
    %cst_17 = arith.constant 1.046880e+00 : bf16
    %32 = vector.broadcast %cst_17 : bf16 to vector<8x128xbf16>
    %33 = arith.mulf %32, %31 : vector<8x128xbf16>
    %c0_18 = arith.constant 0 : index
    %c0_19 = arith.constant 0 : index
    %34 = vector.load %arg6[%c0_18, %c0_19] : memref<128x2xbf16, #tpu.memory_space<vmem>>, vector<128x2xbf16>
    %cst_20 = arith.constant dense<0.000000e+00> : vector<8x2xf32>
    %35 = tpu.matmul %33, %34, %cst_20 {dimension_numbers = #tpu.dot_dimension_numbers<[1], [0], [0], [1], [0, 0, 1, 1], [], []>} : vector<8x128xbf16>, vector<128x2xbf16>, vector<8x2xf32> -> vector<8x2xf32>
    %c0_21 = arith.constant 0 : index
    %c0_22 = arith.constant 0 : index
    %36 = vector.load %arg7[%c0_21, %c0_22] : memref<1x2xf32, #tpu.memory_space<vmem>>, vector<1x2xf32>
    %37 = vector.broadcast %36 : vector<1x2xf32> to vector<8x2xf32>
    %38 = arith.addf %35, %37 : vector<8x2xf32>
    %cst_23 = arith.constant 0.000000e+00 : f32
    %39 = vector.broadcast %cst_23 : f32 to vector<8x2xf32>
    %40 = arith.cmpf ogt, %38, %39 : vector<8x2xf32>
    %41 = math.exp %38 : vector<8x2xf32>
    %cst_24 = arith.constant 1.000000e+00 : f32
    %42 = vector.broadcast %cst_24 : f32 to vector<8x2xf32>
    %43 = arith.subf %41, %42 : vector<8x2xf32>
    %cst_25 = arith.constant 1.67326319 : f32
    %44 = vector.broadcast %cst_25 : f32 to vector<8x2xf32>
    %45 = arith.mulf %44, %43 : vector<8x2xf32>
    %46 = arith.select %40, %38, %45 : vector<8x2xi1>, vector<8x2xf32>
    %cst_26 = arith.constant 1.05070102 : f32
    %47 = vector.broadcast %cst_26 : f32 to vector<8x2xf32>
    %48 = arith.mulf %47, %46 : vector<8x2xf32>
    %c0_27 = arith.constant 0 : index
    %c0_28 = arith.constant 0 : index
    %49 = vector.load %arg8[%c0_27, %c0_28] : memref<8x2xf32, #tpu.memory_space<vmem>>, vector<8x2xf32>
    tpu.vector_store %arg8[%c0_27, %c0_28], %48 {strides = array<i32>} : memref<8x2xf32, #tpu.memory_space<vmem>>, vector<8x2xf32>,
    return
  }
  func.func @transform_0(%arg0: i32) -> (i32, i32) {
    %c0_i32 = arith.constant 0 : i32
    %c0_i32_0 = arith.constant 0 : i32
    return %arg0, %c0_i32 : i32, i32
  }
  func.func @transform_1(%arg0: i32) -> (i32, i32) {
    %c0_i32 = arith.constant 0 : i32
    %c0_i32_0 = arith.constant 0 : i32
    %c0_i32_1 = arith.constant 0 : i32
    return %c0_i32, %c0_i32_0 : i32, i32
  }
  func.func @transform_2(%arg0: i32) -> (i32, i32) {
    %c0_i32 = arith.constant 0 : i32
    %c0_i32_0 = arith.constant 0 : i32
    %c0_i32_1 = arith.constant 0 : i32
    return %c0_i32, %c0_i32_0 : i32, i32
  }
  func.func @transform_3(%arg0: i32) -> (i32, i32) {
    %c0_i32 = arith.constant 0 : i32
    %c0_i32_0 = arith.constant 0 : i32
    %c0_i32_1 = arith.constant 0 : i32
    return %c0_i32, %c0_i32_0 : i32, i32
  }
  func.func @transform_4(%arg0: i32) -> (i32, i32) {
    %c0_i32 = arith.constant 0 : i32
    %c0_i32_0 = arith.constant 0 : i32
    %c0_i32_1 = arith.constant 0 : i32
    return %c0_i32, %c0_i32_0 : i32, i32
  }
  func.func @transform_5(%arg0: i32) -> (i32, i32) {
    %c0_i32 = arith.constant 0 : i32
    %c0_i32_0 = arith.constant 0 : i32
    %c0_i32_1 = arith.constant 0 : i32
    return %c0_i32, %c0_i32_0 : i32, i32
  }
  func.func @transform_6(%arg0: i32) -> (i32, i32) {
    %c0_i32 = arith.constant 0 : i32
    %c0_i32_0 = arith.constant 0 : i32
    %c0_i32_1 = arith.constant 0 : i32
    return %c0_i32, %c0_i32_0 : i32, i32
  }
  func.func @transform_7(%arg0: i32) -> (i32, i32) {
    %c0_i32 = arith.constant 0 : i32
    %c0_i32_0 = arith.constant 0 : i32
    return %arg0, %c0_i32 : i32, i32
  }
}

</mosaic_0001>

<bundles_post_ra>
// kernel: generator_forward.1
= control target key start
LH: loop header
LB: loop body
LE: loop exit
PB: predicated region body
PF: predicated region fallthrough
CT: control target
= control target key end

     0   :  { %v476_v0 = vmov 0.0   ;;  %vm51_vm0 = vcmask 1046528   ;;  %vm477_vm1 = vmmov 0   ;;  %vm47_vm2 = vcmask 244736   ;;  %s612_s1 = inlined_call_operand.vmem [shape: bf16[30,128], index: 1, kind: input, shape index: {}]   ;;  %s613_s0 = inlined_call_operand.vmem [shape: f32[8,30], index: 0, kind: input, shape index: {}]   ;;  %s614_s3 = inlined_call_operand.vmem [shape: bf16[128,128], index: 3, kind: input, shape index: {}]   ;;  %s615_s5 = inlined_call_operand.vmem [shape: bf16[128,2], index: 5, kind: input, shape index: {}]   ;;  %s616_s2 = inlined_call_operand.vmem [shape: bf16[1,128], index: 2, kind: input, shape index: {}]   ;;  %s617_s4 = inlined_call_operand.vmem [shape: bf16[1,128], index: 4, kind: input, shape index: {}]   ;;  %s618_s6 = inlined_call_operand.vmem [shape: f32[1,2], index: 6, kind: input, shape index: {}]   ;;  %s619_s7 = inlined_call_operand.vmem [shape: f32[8,2], index: 7, kind: output, shape index: {}]  }
   0x1   :  { %401 = vmatprep.subr.bf16.mxu0 %v476_v0  ;;  %v452_v1 = vld [vmem:[%s612_s1] sm:$0xff]   ;;  %405 = vmatprep.mubr.msk.bf16.mxu0 %vm477_vm1, %v476_v0  ;;  %v453_v2 = vld [vmem:[%s612_s1 + $0x8] sm:$0x7f]   ;;  %v456_v8 = vld [vmem:[%s614_s3 + $0x10] sm:$0xff]   ;;  %v100_v16 = vlaneseq  ;;  %v478_v30 = vmov 1065369472  }
   0x2   :  { %409 = vmatprep.subr.bf16.mxu1 %v476_v0  ;;  %425 = vmatprep.mubr.msk.bf16.mxu1 %vm477_vm1, %v476_v0  ;;  %v30_v3 = vld [vmem:[%s613_s0] sm:$0xff]  ;;  %v53_v4 = vsel %vm51_vm0, %v453_v2, 0  ;;  %v455_v6 = vld [vmem:[%s614_s3 + $0x8] sm:$0xff]   ;;  %v457_v9 = vld [vmem:[%s614_s3 + $0x18] sm:$0xff]   ;;  %vm353_vm6 = vcmask 15360  }
   0x3   :  { %402 = vmatpush3.bf16.msra.mxu0 %v452_v1  ;;  %v454_v5 = vld [vmem:[%s614_s3] sm:$0xff]   ;;  %v31_v7 = vpack.c.bf16 %v30_v3, %v30_v3  ;;  %v459_v11 = vld [vmem:[%s614_s3 + $0x28] sm:$0xff]   ;;  %v460_v12 = vld [vmem:[%s614_s3 + $0x30] sm:$0xff]   ;;  %v101_v17 = vshrl.u32 %v100_v16, 7 }
   0x4   :  { %403 = vmatprep.subr.bf16.mxu0 %v476_v0  ;;  %410 = vmatpush3.bf16.msra.mxu1 %v454_v5  ;;  %v458_v10 = vld [vmem:[%s614_s3 + $0x20] sm:$0xff]   ;;  %v461_v13 = vld [vmem:[%s614_s3 + $0x38] sm:$0xff]   ;;  %v463_v15 = vld [vmem:[%s615_s5 + $0x8] sm:$0xff]  }
   0x5   :  { %411 = vmatprep.subr.bf16.mxu1 %v476_v0  ;;  %v462_v14 = vld [vmem:[%s615_s5] sm:$0xff]   ;;  %v102_v20 = vsub.s32 0, %v101_v17  ;;  %v464_v35 = vld [vmem:[%s615_s5 + $0x10] sm:$0xff]   ;;  %v465_v36 = vld [vmem:[%s615_s5 + $0x18] sm:$0xff]  }
   0x6   :  { %v96_v18 = vld [vmem:[%s616_s2] sm:$0x1]  ;;  %v467_v38 = vld [vmem:[%s615_s5 + $0x28] sm:$0xff]   ;;  %v468_v39 = vld [vmem:[%s615_s5 + $0x30] sm:$0xff]  }
   0x7   :  { %404 = vmatpush3.bf16.msra.mxu0 %v53_v4  ;;  %v98_v19 = vpack.i.b16 %v96_v18, %v96_v18  ;;  %v466_v37 = vld [vmem:[%s615_s5 + $0x20] sm:$0xff]   ;;  %v469_v40 = vld [vmem:[%s615_s5 + $0x38] sm:$0xff]  }
   0x8   :  { %429 = vmatprep.subr.bf16.mxu0 %v476_v0  ;;  %412 = vmatpush3.bf16.msra.mxu1 %v455_v6  ;;  %v218_v41 = vld [vmem:[%s617_s4] sm:$0x1] }
   0x9   :  { %413 = vmatprep.subr.bf16.mxu1 %v476_v0  ;;  %v103_v21 = vrot.slane %v98_v19, %v102_v20  ;;  %v220_v42 = vpack.i.b16 %v218_v41, %v218_v41  ;;  %v370_v56 = vld [vmem:[%s618_s6] ss:$0 sm:$0xff] }
   0xa   :  { %406 = vmatmul.mubr.msk.bf16.vlgmr.msra.gmra.mrb[0].mxu0 %vm47_vm2, %v31_v7 }
   0xb   :  { %445 = vmatprep.mubr.msk.bf16.mxu0 %vm477_vm1, %v476_v0  ;;  %430 = vmatpush3.bf16.msra.mxu0 %v462_v14  ;;  %v225_v43 = vrot.slane %v220_v42, %v102_v20 }
   0xc   :  { %414 = vmatpush3.bf16.msra.mxu1 %v456_v8  ;;  %431 = vmatprep.subr.bf16.mxu0 %v476_v0 }
   0xd   :  { %415 = vmatprep.subr.bf16.mxu1 %v476_v0 }
   0xf   :  { %432 = vmatpush3.bf16.msra.mxu0 %v463_v15 }
  0x10   :  { %416 = vmatpush3.bf16.msra.mxu1 %v457_v9  ;;  %433 = vmatprep.subr.bf16.mxu0 %v476_v0 }
  0x11   :  { %417 = vmatprep.subr.bf16.mxu1 %v476_v0 }
  0x13   :  { %434 = vmatpush3.bf16.msra.mxu0 %v464_v35 }
  0x14   :  { %418 = vmatpush3.bf16.msra.mxu1 %v458_v10  ;;  %435 = vmatprep.subr.bf16.mxu0 %v476_v0 }
  0x15   :  { %419 = vmatprep.subr.bf16.mxu1 %v476_v0 }
  0x17   :  { %436 = vmatpush3.bf16.msra.mxu0 %v465_v36 }
  0x18   :  { %420 = vmatpush3.bf16.msra.mxu1 %v459_v11  ;;  %437 = vmatprep.subr.bf16.mxu0 %v476_v0 }
  0x19   :  { %421 = vmatprep.subr.bf16.mxu1 %v476_v0 }
  0x1b   :  { %438 = vmatpush3.bf16.msra.mxu0 %v466_v37 }
  0x1c   :  { %422 = vmatpush3.bf16.msra.mxu1 %v460_v12  ;;  %439 = vmatprep.subr.bf16.mxu0 %v476_v0 }
  0x1d   :  { %423 = vmatprep.subr.bf16.mxu1 %v476_v0 }
  0x1f   :  { %440 = vmatpush3.bf16.msra.mxu0 %v467_v38 }
  0x20   :  { %424 = vmatpush3.bf16.msra.mxu1 %v461_v13  ;;  %441 = vmatprep.subr.bf16.mxu0 %v476_v0 }
  0x23   :  { %442 = vmatpush3.bf16.msra.mxu0 %v468_v39 }
  0x24   :  { %443 = vmatprep.subr.bf16.mxu0 %v476_v0 }
  0x27   :  { %444 = vmatpush3.bf16.msra.mxu0 %v469_v40 }
  0xdd   :  { %v89_v22 = vpop.f32.mrb[0].mxu0 }
  0xde   :  { %v95_v23 = vpack.c.bf16 %v89_v22, %v89_v22  ;;  %v407_v24 = vpop.f32.mrb[1].mxu0 }
  0xdf   :  { %v92_v25 = vpop.f32.mrb[2].mxu0 }
  0xe0   :  { %v104_v26 = vadd.bf16 %v103_v21, %v95_v23  ;;  %v408_v27 = vpop.f32.mrb[3].mxu0 }
  0xe2   :  { %v107_v28 = vmul.bf16 1069105081, %v104_v26  ;;  %vm105_vm3 = vcmp.gt.bf16.partialorder %v104_v26, 0 }
  0xe4   :  { %470 = vpow.bf16 %v107_v28 }
  0xef   :  { %v471_v29 = vpop.eup %470 }
  0xf0   :  { %v109_v31 = vsub.bf16 %v471_v29, %v478_v30 }
  0xf2   :  { %v110_v32 = vmul.bf16 1071005654, %v109_v31 }
  0xf4   :  { %v111_v33 = vsel %vm105_vm3, %v104_v26, %v110_v32 }
  0xf5   :  { %v112_v34 = vmul.bf16 1065762694, %v111_v33 }
  0xf7   :  { %426 = vmatmul.mubr.bf16.vlgmr.msra.gmra.mrb[0].mxu1 %v112_v34 }
 0x1ca   :  { %v211_v44 = vpop.f32.mrb[0].mxu1 }
 0x1cb   :  { %v217_v45 = vpack.c.bf16 %v211_v44, %v211_v44  ;;  %v427_v46 = vpop.f32.mrb[1].mxu1 }
 0x1cc   :  { %v214_v47 = vpop.f32.mrb[2].mxu1 }
 0x1cd   :  { %v226_v48 = vadd.bf16 %v225_v43, %v217_v45  ;;  %v428_v49 = vpop.f32.mrb[3].mxu1 }
 0x1cf   :  { %v229_v50 = vmul.bf16 1069105081, %v226_v48  ;;  %vm227_vm4 = vcmp.gt.bf16.partialorder %v226_v48, 0 }
 0x1d1   :  { %472 = vpow.bf16 %v229_v50 }
 0x1dc   :  { %v473_v51 = vpop.eup %472 }
 0x1dd   :  { %v231_v52 = vsub.bf16 %v473_v51, %v478_v30 }
 0x1df   :  { %v232_v53 = vmul.bf16 1071005654, %v231_v52 }
 0x1e1   :  { %v233_v54 = vsel %vm227_vm4, %v226_v48, %v232_v53 }
 0x1e2   :  { %v234_v55 = vmul.bf16 1065762694, %v233_v54 }
 0x1e4   :  { %446 = vmatmul.mubr.bf16.vlgmr.msra.gmra.mrb[4].mxu0 %v234_v55 }
 0x2b7   :  { %v340_v57 = vpop.f32.mrb[4].mxu0 }
 0x2b8   :  { %v341_v58 = vadd.f32 %v370_v56, %v340_v57  ;;  %v447_v59 = vpop.f32.mrb[5].mxu0 }
 0x2b9   :  { %v343_v60 = vpop.f32.mrb[6].mxu0 }
 0x2ba   :  { %v347_v61 = vmul.f32 1.442695, %v341_v58  ;;  %v448_v62 = vpop.f32.mrb[7].mxu0  ;;  %vm346_vm5 = vcmp.gt.f32.partialorder %v341_v58, 0.0 }
 0x2bc   :  { %474 = vpow2.f32 %v347_v61 }
 0x2c6   :  { %v475_v63 = vpop.eup %474 }
 0x2c7   :  { %v379_v0 = vadd.f32 -1.0, %v475_v63 }
 0x2c9   :  { %v350_v1 = vmul.f32 1.6732632, %v379_v0 }
 0x2cb   :  { %v351_v2 = vsel %vm346_vm5, %v341_v58, %v350_v1 }
 0x2cc   :  { %v352_v3 = vmul.f32 1.050701, %v351_v2 }
 0x2ce   :  { %354 = vst.msk [vmem:[%s619_s7] sm:$0xff] %vm353_vm6, %v352_v3 }

</bundles_post_ra>
